<compile_context>
chip_gen: v7x
topology: tpu7x:2x2x1
jax: 0.10.0
libtpu: 0.0.40
codegen_flags: <defaults>
</compile_context>

<pallas_src>
from collections import OrderedDict

import jax
import jax.numpy as jnp
from jax import lax
from jax.experimental import pallas as pl
from jax.experimental.pallas import tpu as pltpu


def _round_up(x, m):
    return ((x + m - 1) // m) * m


# ---------------------------------------------------------------------------
# Sub-node modules (deterministic parameter init + pure-JAX reference ops)
# ---------------------------------------------------------------------------

class ConvNode:
    """nn.Conv2d(cin, cout, kernel=3, padding=1) equivalent."""

    def __init__(self, cin, cout, key):
        kw_, kb_ = jax.random.split(key)
        self.w = 0.1 * jax.random.normal(kw_, (cout, cin, 3, 3), jnp.float32)   # OIHW
        self.b = 0.1 * jax.random.normal(kb_, (cout,), jnp.float32)

    def ref_forward(self, x):
        y = lax.conv_general_dilated(
            x, self.w, window_strides=(1, 1), padding=((1, 1), (1, 1)),
            dimension_numbers=("NCHW", "OIHW", "NCHW"))
        return y + self.b[None, :, None, None]


class LinearNode:
    """nn.Linear(fin, fout) equivalent."""

    def __init__(self, fin, fout, key):
        kw_, kb_ = jax.random.split(key)
        self.w = 0.1 * jax.random.normal(kw_, (fout, fin), jnp.float32)
        self.b = 0.1 * jax.random.normal(kb_, (fout,), jnp.float32)

    def ref_forward(self, x):
        return x @ self.w.T + self.b


class ReluNode:
    def ref_forward(self, x):
        return jnp.maximum(x, 0.0)


class AddNode:
    def ref_forward(self, a, b):
        return a + b


# ---------------------------------------------------------------------------
# DebugCell graph executor (mirrors the torch module's forward semantics)
# ---------------------------------------------------------------------------

class DebugCell:
    """Graph executor mirroring the torch DebugCell.

    For the concrete cell instantiated in __main__ the whole forward is fused into a
    single Pallas TPU kernel (weights packed + relaid out once at construction);
    `forward_reference` keeps the generic graph walk in pure JAX for validation.
    """

    _FUSED_TOPOLOGY = {2: [0], 3: [1], 4: [2], 5: [4, 2]}
    _FUSED_SPLITS = {2: [None], 3: [None], 4: [None], 5: [0, 1]}

    def __init__(self, in_degree, subnode_list, cell_topology, split_tree, shape_info):
        self.in_degree = in_degree
        self.subnode_list = subnode_list
        self.cell_topology = cell_topology
        self.split_tree = split_tree
        self.shape_info = shape_info
        disconnect_nodes = set(cell_topology.keys())
        for i in self.cell_topology:
            for t in self.cell_topology[i]:
                if t in disconnect_nodes:
                    disconnect_nodes.remove(t)
        # TODO(synk): reference iterates a python `set`; sorted() matches small-int hash order.
        self.disconnect_nodes = sorted(disconnect_nodes)

        self._fusable = self._check_fusable()
        if self._fusable:
            self._fused_forward = self._build_fused_forward()

    # ---------------------------------------------------------------- fusability
    def _check_fusable(self):
        if self.in_degree != 2 or len(self.subnode_list) != 4:
            return False
        ok_types = (isinstance(self.subnode_list[0], ConvNode)
                    and isinstance(self.subnode_list[1], LinearNode)
                    and isinstance(self.subnode_list[2], ReluNode)
                    and isinstance(self.subnode_list[3], AddNode))
        ok_topo = all(list(self.cell_topology.get(k, [])) == v
                      for k, v in self._FUSED_TOPOLOGY.items())
        ok_split = all(list(self.split_tree.get(k, [])) == v
                       for k, v in self._FUSED_SPLITS.items())
        if not (ok_types and ok_topo and ok_split and self.disconnect_nodes == [3, 5]):
            return False
        # Layout feasibility for the single lane-dense fused output slab.
        N, cin, H, W = self.shape_info[0][0]
        M, fin = self.shape_info[1][0]
        fout = self.subnode_list[1].w.shape[0]
        HW = H * W
        return (N == 2 and HW % 128 == 0 and HW % fout == 0
                and (M * fout) % HW == 0 and M % (HW // fout) == 0
                and (9 * cin + 1) <= HW)

    # ------------------------------------------------------- fused-kernel builder
    def _build_fused_forward(self):
        conv, lin = self.subnode_list[0], self.subnode_list[1]
        Cout, Cin = conv.w.shape[0], conv.w.shape[1]
        Fout, Fin = lin.w.shape
        _, _, H, W = self.shape_info[0][0]
        M, _ = self.shape_info[1][0]

        HW = H * W                        # 256  -> lane width of the fused output slab
        Cin9 = 9 * Cin                    # 36   -> im2col contraction size
        G = HW // Fout                    # 4    -> linear rows packed per output row
        LR = (M * Fout) // HW             # 2    -> output rows used by the linear sink
        WLB0 = _round_up(Cout + 1, 8)     # 16   -> sublane-aligned start of wl block

        # ---- one-time MXU-ready weight packing: all 4 params -> ONE buffer (1 DMA) ----
        wc = conv.w.reshape(Cout, Cin9)               # (8, 36), cols ordered (ci, kh, kw)
        bc = conv.b.reshape(Cout, 1)                  # (8, 1)
        wl = jnp.transpose(lin.w)                     # (Fin, Fout) = (32, 64)
        # G-way block-diagonal expansion so x1.reshape(LR, G*Fin) @ wlb yields the
        # linear sink directly as a lane-dense (LR, HW) slab in torch-flatten order.
        wlb = jnp.zeros((G * Fin, HW), jnp.float32)
        for g in range(G):
            wlb = wlb.at[g * Fin:(g + 1) * Fin, g * Fout:(g + 1) * Fout].set(wl)
        blG = jnp.tile(lin.b.reshape(1, Fout), (1, G))                     # (1, HW)

        wpack = jnp.zeros((WLB0 + G * Fin, HW), jnp.float32)               # (144, 256)
        wpack = wpack.at[0:Cout, 0:Cin9].set(wc)
        wpack = wpack.at[0:Cout, Cin9:Cin9 + 1].set(bc)
        wpack = wpack.at[Cout:Cout + 1, :].set(blG)
        wpack = wpack.at[WLB0:WLB0 + G * Fin, :].set(wlb)
        self._wpack = wpack

        # ---- the fused kernel: two MXU dots + a few VPU ops, one lane-dense output ----
        def kernel(patches_ref, x1_ref, w_ref, out_ref):
            # node 3: Linear(Fin -> Fout) sink, written straight into rows [0, LR).
            wlb_v = w_ref[WLB0:WLB0 + G * Fin, :]            # (G*Fin, HW) static slice
            bl_v = w_ref[Cout:Cout + 1, :]                   # (1, HW)
            out_ref[0:LR, :] = (
                jnp.dot(x1_ref[...], wlb_v, preferred_element_type=jnp.float32) + bl_v)

            # node 2: Conv2d(Cin->Cout, 3x3, pad 1) as ONE plain NN MXU dot over the
            # wrapper-side im2col patches (channel-major output, no transpose needed).
            wc_v = w_ref[0:Cout, 0:Cin9]                     # (Cout, 9*Cin)
            bc_v = w_ref[0:Cout, Cin9:Cin9 + 1]              # (Cout, 1)
            conv_v = (jnp.dot(wc_v, patches_ref[...],
                              preferred_element_type=jnp.float32) + bc_v)  # (Cout, N*HW)

            # nodes 4 + 5: relu(conv[batch 0]) + conv[batch 1]  (sink); already
            # channel-major (Cout, HW), so rows [LR, LR+Cout) flatten to NCHW order.
            out_ref[LR:LR + Cout, :] = (jnp.maximum(conv_v[:, 0:HW], 0.0)
                                        + conv_v[:, HW:2 * HW])

        vmem_spec = pl.BlockSpec(memory_space=pltpu.MemorySpace.VMEM)

        def fused(wpack_arg, x0, x1):
            # Wrapper-side im2col (one cheap XLA fusion inside this jit): K-major
            # patches (9*Cin, N*H*W) so the kernel input DMA is contiguous and the
            # conv rhs is 100% lane-dense.
            Nb = x0.shape[0]
            xp = jnp.pad(x0, ((0, 0), (0, 0), (1, 1), (1, 1)))     # (N, Cin, H+2, W+2)
            wins = jnp.stack([xp[:, :, kh:kh + H, kw:kw + W]
                              for kh in range(3) for kw in range(3)], axis=2)
            patches = wins.transpose(1, 2, 0, 3, 4).reshape(Cin9, Nb * HW)   # (36, 512)
            x1r = x1.reshape(LR, G * Fin)                                    # (2, 128)

            out = pl.pallas_call(
                kernel,
                out_shape=jax.ShapeDtypeStruct((LR + Cout, HW), jnp.float32),
                in_specs=[vmem_spec, vmem_spec, vmem_spec],
                out_specs=vmem_spec,
            )(patches, x1r, wpack_arg)
            # Row-major flatten of the slab IS torch.cat([lin.reshape(-1), add.reshape(-1)]).
            return out.reshape(-1)

        fused_jit = jax.jit(fused)
        return lambda x0, x1: fused_jit(self._wpack, x0, x1)

    # --------------------------------------------------------------------- forward
    def forward(self, *input_list):
        assert len(input_list) == self.in_degree
        if not self._fusable:
            # TODO(synk): arbitrary topologies fall back to the un-fused pure-JAX walk.
            return self.forward_reference(*input_list)
        return self._fused_forward(*input_list)

    def forward_reference(self, *input_list):
        """Generic graph walk (pure JAX) — the semantic spec, used for validation."""
        assert len(input_list) == self.in_degree
        memory = list(input_list)
        node_idx = len(input_list)
        for node in self.subnode_list:
            sub_node_input = []
            for idx, in_vertex in enumerate(self.cell_topology[node_idx]):
                split_info = self.split_tree[node_idx][idx]
                if split_info is not None:
                    sub_node_input.append(memory[in_vertex][split_info])
                else:
                    sub_node_input.append(memory[in_vertex])
            memory.append(node.ref_forward(*sub_node_input))
            node_idx += 1
        return jnp.concatenate([memory[i].reshape(-1) for i in self.disconnect_nodes])


# ---------------------------------------------------------------------------
# Concrete cell instantiation + driver
# ---------------------------------------------------------------------------

if __name__ == "__main__":
    # Graph:
    #   0: input x0 (NCHW [2,4,16,16])      1: input x1 ([8,32])
    #   2: Conv2d(4->8, k3, pad1)(mem[0])              -> [2,8,16,16]
    #   3: Linear(32->64)(mem[1])                      -> [8,64]        (sink)
    #   4: ReLU(mem[2])                                -> [2,8,16,16]
    #   5: mem[4][0] + mem[2][1]  (dim-0 splits)       -> [8,16,16]     (sink)
    cell_topology = OrderedDict([
        (0, []), (1, []),
        (2, [0]),
        (3, [1]),
        (4, [2]),
        (5, [4, 2]),
    ])
    split_tree = OrderedDict([
        (0, []), (1, []),
        (2, [None]),
        (3, [None]),
        (4, [None]),
        (5, [0, 1]),
    ])
    shape_info = OrderedDict([
        (0, [[2, 4, 16, 16]]), (1, [[8, 32]]),
        (2, [[2, 8, 16, 16]]), (3, [[8, 64]]),
        (4, [[2, 8, 16, 16]]), (5, [[8, 16, 16]]),
    ])

    pkey = jax.random.PRNGKey(42)
    kc, kl = jax.random.split(pkey)
    subnode_list = [ConvNode(4, 8, kc), LinearNode(32, 64, kl), ReluNode(), AddNode()]

    cell = DebugCell(2, subnode_list, cell_topology, split_tree, shape_info)

    key = jax.random.PRNGKey(0)
    k0, k1 = jax.random.split(key)
    x0 = jax.random.normal(k0, (2, 4, 16, 16), jnp.float32)   # NCHW, like torch
    x1 = jax.random.normal(k1, (8, 32), jnp.float32)

    out = jax.block_until_ready(cell.forward(x0, x1))
    ref = jax.block_until_ready(cell.forward_reference(x0, x1))

    assert out.shape == (8 * 64 + 8 * 16 * 16,), out.shape
    assert out.dtype == jnp.float32
    assert jnp.allclose(out, ref, atol=5e-2, rtol=5e-2), \
        float(jnp.max(jnp.abs(out - ref)))
    print("KERNEL_OK")
</pallas_src>

<mosaic_0001>
module attributes {stable_mosaic.version = 11 : i64} {
  func.func @kernel(%arg0: memref<36x512xf32, #tpu.memory_space<vmem>>, %arg1: memref<2x128xf32, #tpu.memory_space<vmem>>, %arg2: memref<144x256xf32, #tpu.memory_space<vmem>>, %arg3: memref<10x256xf32, #tpu.memory_space<vmem>>) attributes {dimension_semantics = [], scalar_prefetch = 0 : i64, scratch_operands = 0 : i64, tpu.core_type = #tpu.core_type<tc>} {
    %c16 = arith.constant 16 : index
    %c0 = arith.constant 0 : index
    %0 = vector.load %arg2[%c16, %c0] : memref<144x256xf32, #tpu.memory_space<vmem>>, vector<128x256xf32>
    %c8 = arith.constant 8 : index
    %c0_0 = arith.constant 0 : index
    %1 = vector.load %arg2[%c8, %c0_0] : memref<144x256xf32, #tpu.memory_space<vmem>>, vector<1x256xf32>
    %c0_1 = arith.constant 0 : index
    %c0_2 = arith.constant 0 : index
    %2 = vector.load %arg1[%c0_1, %c0_2] : memref<2x128xf32, #tpu.memory_space<vmem>>, vector<2x128xf32>
    %cst = arith.constant dense<0.000000e+00> : vector<2x256xf32>
    %3 = tpu.matmul %2, %0, %cst {dimension_numbers = #tpu.dot_dimension_numbers<[1], [0], [0], [1], [0, 0, 1, 1], [], []>} : vector<2x128xf32>, vector<128x256xf32>, vector<2x256xf32> -> vector<2x256xf32>
    %4 = vector.broadcast %1 : vector<1x256xf32> to vector<2x256xf32>
    %5 = arith.addf %3, %4 : vector<2x256xf32>
    %c0_3 = arith.constant 0 : index
    %c0_4 = arith.constant 0 : index
    %6 = vector.load %arg3[%c0_3, %c0_4] : memref<10x256xf32, #tpu.memory_space<vmem>>, vector<2x256xf32>
    tpu.vector_store %arg3[%c0_3, %c0_4], %5 {strides = array<i32>} : memref<10x256xf32, #tpu.memory_space<vmem>>, vector<2x256xf32>,
    %c0_5 = arith.constant 0 : index
    %c0_6 = arith.constant 0 : index
    %7 = vector.load %arg2[%c0_5, %c0_6] : memref<144x256xf32, #tpu.memory_space<vmem>>, vector<8x36xf32>
    %c0_7 = arith.constant 0 : index
    %c36 = arith.constant 36 : index
    %8 = vector.load %arg2[%c0_7, %c36] : memref<144x256xf32, #tpu.memory_space<vmem>>, vector<8x1xf32>
    %c0_8 = arith.constant 0 : index
    %c0_9 = arith.constant 0 : index
    %9 = vector.load %arg0[%c0_8, %c0_9] : memref<36x512xf32, #tpu.memory_space<vmem>>, vector<36x512xf32>
    %cst_10 = arith.constant dense<0.000000e+00> : vector<8x512xf32>
    %10 = tpu.matmul %7, %9, %cst_10 {dimension_numbers = #tpu.dot_dimension_numbers<[1], [0], [0], [1], [0, 0, 1, 1], [], []>} : vector<8x36xf32>, vector<36x512xf32>, vector<8x512xf32> -> vector<8x512xf32>
    %11 = vector.broadcast %8 : vector<8x1xf32> to vector<8x512xf32>
    %12 = arith.addf %10, %11 : vector<8x512xf32>
    %13 = vector.extract_strided_slice %12 {offsets = [0, 0], sizes = [8, 256], strides = [1, 1]} : vector<8x512xf32> to vector<8x256xf32>
    %cst_11 = arith.constant 0.000000e+00 : f32
    %14 = vector.broadcast %cst_11 : f32 to vector<8x256xf32>
    %15 = arith.maximumf %13, %14 : vector<8x256xf32>
    %16 = vector.extract_strided_slice %12 {offsets = [0, 256], sizes = [8, 256], strides = [1, 1]} : vector<8x512xf32> to vector<8x256xf32>
    %17 = arith.addf %15, %16 : vector<8x256xf32>
    %c2 = arith.constant 2 : index
    %c0_12 = arith.constant 0 : index
    %18 = vector.load %arg3[%c2, %c0_12] : memref<10x256xf32, #tpu.memory_space<vmem>>, vector<8x256xf32>
    tpu.vector_store %arg3[%c2, %c0_12], %17 {strides = array<i32>} : memref<10x256xf32, #tpu.memory_space<vmem>>, vector<8x256xf32>,
    return
  }
}

</mosaic_0001>

<bundles_post_ra>
// kernel: fused.1
= control target key start
LH: loop header
LB: loop body
LE: loop exit
PB: predicated region body
PF: predicated region fallthrough
CT: control target
= control target key end

     0   :  { %v393_v3 = vmov 0.0   ;;  %v394_v8 = vmov 36   ;;  %vm162_vm0 = vcmask 1043456   ;;  %vm159_vm1 = vcmask 293888   ;;  %s607_s2 = inlined_call_operand.vmem [shape: f32[144,256], index: 2, kind: input, shape index: {}]   ;;  %s608_s0 = inlined_call_operand.vmem [shape: f32[36,512], index: 0, kind: input, shape index: {}]   ;;  %s609_s1 = inlined_call_operand.vmem [shape: f32[2,128], index: 1, kind: input, shape index: {}]   ;;  %s610_s3 = inlined_call_operand.vmem [shape: f32[10,256], index: 3, kind: output, shape index: {}]  }
   0x1   :  { %v15_v0 = vld [vmem:[%s607_s2 + $0x28] sm:$0xff]  ;;  %v17_v1 = vld [vmem:[%s607_s2 + $0x38] sm:$0xff]  ;;  %239 = vmatprep.mubr.f32.mxu1 %v393_v3  ;;  %124 = vmatprep.mubr.f32.mxu0 %v393_v3  ;;  %v14_v6 = vld [vmem:[%s607_s2 + $0x20] sm:$0xff] }
   0x2   :  { %v135_v2 = vld [vmem:[%s608_s0 + $0x8] sm:$0xff]  ;;  %v342_v4 = vpack.c.bf16 %v17_v1, %v15_v0  ;;  %v16_v7 = vld [vmem:[%s607_s2 + $0x30] sm:$0xff]  ;;  %392 = vset.pattern.permute.xlu0 %v394_v8  ;;  %v134_v11 = vld [vmem:[%s608_s0] sm:$0xff] }
   0x3   :  { %v139_v5 = vld [vmem:[%s608_s0 + $0x28] sm:$0xff]  ;;  %v344_v10 = vpack.c.bf16 %v16_v7, %v14_v6  ;;  %v138_v12 = vld [vmem:[%s608_s0 + $0x20] sm:$0xff]  ;;  %v21_v15 = vld [vmem:[%s607_s2 + $0x58] sm:$0xff] }
   0x4   :  { %v374_v9 = vpack.c.bf16 %v139_v5, %v135_v2  ;;  %v19_v13 = vld [vmem:[%s607_s2 + $0x48] sm:$0xff]  ;;  %343 = vmatprep.subr.bf16.mxu0 %v342_v4  ;;  %v376_v14 = vpack.c.bf16 %v138_v12, %v134_v11  ;;  %v18_v20 = vld [vmem:[%s607_s2 + $0x40] sm:$0xff]  ;;  %v20_v21 = vld [vmem:[%s607_s2 + $0x50] sm:$0xff] }
   0x5   :  { %v143_v16 = vld [vmem:[%s608_s0 + $0x48] sm:$0xff]  ;;  %345 = vmatpush1.bf16.msra.mxu0 %v344_v10  ;;  %v346_v18 = vpack.c.bf16 %v21_v15, %v19_v13  ;;  %v142_v22 = vld [vmem:[%s608_s0 + $0x40] sm:$0xff]  ;;  %v348_v23 = vpack.c.bf16 %v20_v21, %v18_v20  ;;  %v25_v26 = vld [vmem:[%s607_s2 + $0x78] sm:$0xff]  ;;  %v50_v21 = vlaneseq }
   0x6   :  { %v147_v17 = vld [vmem:[%s608_s0 + $0x68] sm:$0xff]  ;;  %375 = vmatprep.subr.bf16.mxu1 %v374_v9  ;;  %v146_v24 = vld [vmem:[%s608_s0 + $0x60] sm:$0xff]  ;;  %v24_v30 = vld [vmem:[%s607_s2 + $0x70] sm:$0xff] }
   0x7   :  { %v378_v19 = vpack.c.bf16 %v147_v17, %v143_v16  ;;  %377 = vmatpush1.bf16.msra.mxu1 %v376_v14  ;;  %v23_v25 = vld [vmem:[%s607_s2 + $0x68] sm:$0xff]  ;;  %347 = vmatprep.subr.bf16.mxu0 %v346_v18  ;;  %v380_v27 = vpack.c.bf16 %v146_v24, %v142_v22  ;;  %v22_v29 = vld [vmem:[%s607_s2 + $0x60] sm:$0xff]  ;;  %v137_v32 = vld [vmem:[%s608_s0 + $0x18] sm:$0xff] }
   0x8   :  { %v350_v28 = vpack.c.bf16 %v25_v26, %v23_v25  ;;  %v151_v31 = vld [vmem:[%s608_s0 + $0x88] sm:$0xf]  ;;  %v141_v33 = vld [vmem:[%s608_s0 + $0x38] sm:$0xff]  ;;  %v352_v34 = vpack.c.bf16 %v24_v30, %v22_v29  ;;  %v150_v35 = vld [vmem:[%s608_s0 + $0x80] sm:$0xf]  ;;  %v51_v25 = vshrl.u32 %v50_v21, 7 }
   0x9   :  { %379 = vmatprep.subr.bf16.mxu1 %v378_v19  ;;  %349 = vmatpush1.bf16.msra.mxu0 %v348_v23  ;;  %v133_v36 = vld [vmem:[%s607_s2] sm:$0xff]  ;;  %v136_v37 = vld [vmem:[%s608_s0 + $0x10] sm:$0xff]  ;;  %v27_v39 = vld [vmem:[%s607_s2 + $0x88] sm:$0xff]  ;;  %v382_v42 = vpack.c.bf16 %v141_v33, %v137_v32 }
   0xa   :  { %v140_v38 = vld [vmem:[%s608_s0 + $0x30] sm:$0xff]  ;;  %351 = vmatprep.subr.bf16.mxu0 %v350_v28  ;;  %v29_v40 = vld [vmem:[%s607_s2 + $0x98] sm:$0xff]  ;;  %v26_v41 = vld [vmem:[%s607_s2 + $0x80] sm:$0xff]  ;;  %156 = vperm.xlu0 %392, %v133_v36  }
   0xb   :  { %381 = vmatpush1.bf16.msra.mxu1 %v380_v27  ;;  %v354_v43 = vpack.c.bf16 %v29_v40, %v27_v39  ;;  %v28_v44 = vld [vmem:[%s607_s2 + $0x90] sm:$0xff]  ;;  %v145_v45 = vld [vmem:[%s608_s0 + $0x58] sm:$0xff]  ;;  %v384_v47 = vpack.c.bf16 %v140_v38, %v136_v37  ;;  %v31_v48 = vld [vmem:[%s607_s2 + $0xa8] sm:$0xff] }
   0xc   :  { %336 = vmatprep.subr.msk.mxu1 %vm162_vm0, %v151_v31  ;;  %v149_v46 = vld [vmem:[%s608_s0 + $0x78] sm:$0xff]  ;;  %v356_v49 = vpack.c.bf16 %v28_v44, %v26_v41  ;;  %v144_v51 = vld [vmem:[%s608_s0 + $0x50] sm:$0xff]  ;;  %v30_v55 = vld [vmem:[%s607_s2 + $0xa0] sm:$0xff]  ;;  %v52_v31 = vsub.s32 0, %v51_v25 }
   0xd   :  { %353 = vmatpush1.bf16.msra.mxu0 %v352_v34  ;;  %v386_v50 = vpack.c.bf16 %v149_v46, %v145_v45  ;;  %v148_v52 = vld [vmem:[%s608_s0 + $0x70] sm:$0xff]  ;;  %v33_v53 = vld [vmem:[%s607_s2 + $0xb8] sm:$0xff]  ;;  %v35_v57 = vld [vmem:[%s607_s2 + $0xc8] sm:$0xff]  ;;  %v56_v34 = vsub.s32 1, %v51_v25 }
   0xe   :  { %355 = vmatprep.subr.bf16.mxu0 %v354_v43  ;;  %v358_v54 = vpack.c.bf16 %v33_v53, %v31_v48  ;;  %v32_v56 = vld [vmem:[%s607_s2 + $0xb0] sm:$0xff]  ;;  %v37_v58 = vld [vmem:[%s607_s2 + $0xd8] sm:$0xff]  ;;  %v388_v59 = vpack.c.bf16 %v148_v52, %v144_v51  ;;  %v34_v63 = vld [vmem:[%s607_s2 + $0xc0] sm:$0xff] }
   0xf   :  { %337 = vmatpush1.msk.msra.mxu1 %vm162_vm0, %v150_v35  ;;  %v360_v60 = vpack.c.bf16 %v32_v56, %v30_v55  ;;  %v153_v61 = vld [vmem:[%s608_s0 + $0x98] sm:$0xf]  ;;  %v362_v62 = vpack.c.bf16 %v37_v58, %v35_v57  ;;  %v36_v0 = vld [vmem:[%s607_s2 + $0xd0] sm:$0xff]  ;;  %v39_v1 = vld [vmem:[%s607_s2 + $0xe8] sm:$0xff] }
  0x10   :  { %383 = vmatprep.subr.bf16.mxu1 %v382_v42  ;;  %338 = vmatmul.mubr.msk.f32.vlgmr.msra.gmra.mrb[0].mxu1 %vm159_vm1, %v133_v36  ;;  %v41_v2 = vld [vmem:[%s607_s2 + $0xf8] sm:$0xff]  ;;  %v364_v4 = vpack.c.bf16 %v36_v0, %v34_v63  ;;  %v38_v6 = vld [vmem:[%s607_s2 + $0xe0] sm:$0xff]  ;;  %v40_v7 = vld [vmem:[%s607_s2 + $0xf0] sm:$0xff] }
  0x11   :  { %385 = vmatpush1.bf16.msra.mxu1 %v384_v47  ;;  %310 = vmatprep.mubr.f32.mxu1 %v393_v3  ;;  %v152_v3 = vld [vmem:[%s608_s0 + $0x90] sm:$0xf]  ;;  %v366_v5 = vpack.c.bf16 %v41_v2, %v39_v1  ;;  %v43_v8 = vld [vmem:[%s607_s2 + $0x108] sm:$0xff]  ;;  %v45_v9 = vld [vmem:[%s607_s2 + $0x118] sm:$0xff]  ;;  %v368_v10 = vpack.c.bf16 %v40_v7, %v38_v6 }
  0x12   :  { %357 = vmatpush1.bf16.msra.mxu0 %v356_v49  ;;  %387 = vmatprep.subr.bf16.mxu1 %v386_v50  ;;  %v370_v11 = vpack.c.bf16 %v45_v9, %v43_v8  ;;  %v42_v12 = vld [vmem:[%s607_s2 + $0x100] sm:$0xff]  ;;  %v44_v13 = vld [vmem:[%s607_s2 + $0x110] sm:$0xff] }
  0x13   :  { %359 = vmatprep.subr.bf16.mxu0 %v358_v54  ;;  %v372_v14 = vpack.c.bf16 %v44_v13, %v42_v12  ;;  %v48_v15 = vld [vmem:[%s609_s1] sm:$0x3]  ;;  %v335_v33 = vld [vmem:[%s607_s2 + $0x10] ss:$8 sm:$0x3] }
  0x14   :  { %v57_v37 = vrot.slane %v335_v33, %v56_v34 }
  0x15   :  { %389 = vmatpush1.bf16.msra.mxu1 %v388_v59 }
  0x16   :  { %361 = vmatpush1.bf16.msra.mxu0 %v360_v60  ;;  %339 = vmatprep.subr.msk.mxu1 %vm162_vm0, %v153_v61 }
  0x17   :  { %363 = vmatprep.subr.bf16.mxu0 %v362_v62 }
  0x19   :  { %340 = vmatpush1.msk.msra.mxu1 %vm162_vm0, %v152_v3 }
  0x1a   :  { %341 = vmatmul.mubr.msk.f32.vlgmr.msra.gmra.mrb[2].mxu1 %vm159_vm1, %v133_v36  ;;  %365 = vmatpush1.bf16.msra.mxu0 %v364_v4  ;;  %v53_v36 = vrot.slane %v335_v33, %v52_v31 }
  0x1b   :  { %367 = vmatprep.subr.bf16.mxu0 %v366_v5 }
  0x1e   :  { %369 = vmatpush1.bf16.msra.mxu0 %v368_v10 }
  0x1f   :  { %371 = vmatprep.subr.bf16.mxu0 %v370_v11 }
  0x22   :  { %373 = vmatpush1.bf16.msra.mxu0 %v372_v14 }
  0x25   :  { %125 = vmatmul.mubr.f32.vlgmr.msra.gmra.mrb[0].mxu0 %v48_v15 }
  0x89   :  { %v157_v18 = vpop.permute.xlu0 %156 }
  0xe3   :  { %v241_v16 = vpop.f32.mrb[0].mxu1 }
  0xe4   :  { %v243_v17 = vpop.f32.mrb[1].mxu1  ;;  %v242_v19 = vadd.f32 %v241_v16, %v157_v18 }
  0xe5   :  { %v244_v20 = vadd.f32 %v243_v17, %v157_v18 }
  0xe6   :  { %v317_v22 = vmax.f32 %v242_v19, 0.0 }
  0xe7   :  { %v318_v23 = vmax.f32 %v244_v20, 0.0 }
  0xed   :  { %v312_v24 = vpop.f32.mrb[2].mxu1 }
  0xee   :  { %v313_v26 = vadd.f32 %v312_v24, %v157_v18  ;;  %v314_v27 = vpop.f32.mrb[3].mxu1 }
  0xef   :  { %v315_v28 = vadd.f32 %v314_v27, %v157_v18 }
  0xf0   :  { %v319_v29 = vadd.f32 %v317_v22, %v313_v26 }
  0xf1   :  { %v320_v30 = vadd.f32 %v318_v23, %v315_v28 }
  0xf2   :  { %v323_v32 = vrot.slane %v319_v29, 6 }
  0xf3   :  { %v324_v35 = vrot.slane %v320_v30, 6 }
  0xf4   :  { %327 = vst [vmem:[%s610_s3] sm:$0xfc] %v323_v32  ;;  %329 = vst [vmem:[%s610_s3 + $0x10] sm:$0x3] %v323_v32 }
  0xf5   :  { %328 = vst [vmem:[%s610_s3 + $0x8] sm:$0xfc] %v324_v35  ;;  %330 = vst [vmem:[%s610_s3 + $0x18] sm:$0x3] %v324_v35 }
  0xf8   :  { %v126_v38 = vpop.f32.mrb[0].mxu0 }
  0xf9   :  { %v127_v39 = vadd.f32 %v126_v38, %v53_v36  ;;  %v128_v40 = vpop.f32.mrb[1].mxu0 }
  0xfa   :  { %v129_v41 = vadd.f32 %v128_v40, %v57_v37 }
  0xfb   :  { %131 = vst [vmem:[%s610_s3] sm:$0x3] %v127_v39 }
  0xfc   :  { %132 = vst [vmem:[%s610_s3 + $0x8] sm:$0x3] %v129_v41 }

</bundles_post_ra>
